<compile_context>
chip_gen: v6e
topology: v6e:2x2x1
jax: 0.10.0
libtpu: 0.0.40
codegen_flags: <defaults>
</compile_context>

<pallas_src>
import math

import jax
import jax.numpy as jnp
from jax.experimental import pallas as pl
from jax.experimental.pallas import tpu as pltpu


def _freq_trigger_kernel(img_ref, patt_ref, out_ref):
    # img_ref/out_ref: (3, TR, W) uint8 planes ; patt_ref: (TR, W) float32 pattern.
    r = img_ref[0].astype(jnp.int32).astype(jnp.float32)
    g = img_ref[1].astype(jnp.int32).astype(jnp.float32)
    b = img_ref[2].astype(jnp.int32).astype(jnp.float32)

    # RGB -> YCrCb (OpenCV 8-bit convention, delta = 128).  The rounded results are
    # provably in [0, 255] (Y weights sum to 1, |chroma| <= 127.5), so no clip is needed.
    # cv2 rounds half away from zero == floor(x + 0.5) for x >= 0; the +0.5 is folded
    # into the +128 chroma offsets.
    y = 0.299 * r + 0.587 * g + 0.114 * b
    cr = jnp.floor((r - y) * 0.713 + 128.5)
    cb = jnp.floor((b - y) * 0.564 + 128.5)
    y = jnp.floor(y + 0.5)

    # DCT-coefficient bump on Cr/Cb + block IDCT == spatial add of the tiled basis
    # pattern.  The reference then does x_yuv.astype(np.uint8): C-style truncation toward
    # zero with modulo-256 wrap -- reproduced exactly with an i32 trunc + mask.
    patt = patt_ref[...]
    cr = ((cr + patt).astype(jnp.int32) & 255).astype(jnp.float32)
    cb = ((cb + patt).astype(jnp.int32) & 255).astype(jnp.float32)

    # YCrCb -> RGB (OpenCV), round half up + saturate to u8.  The rounding +0.5 is added
    # to y once; clip + int truncation then implement round-half-up + saturation.
    crd = cr - 128.0
    cbd = cb - 128.0
    yh = y + 0.5
    r2 = yh + 1.403 * crd
    g2 = yh - 0.714 * crd - 0.344 * cbd
    b2 = yh + 1.773 * cbd

    def to_u8(x):
        return jnp.clip(x, 0.0, 255.0).astype(jnp.int32).astype(jnp.uint8)

    out_ref[0] = to_u8(r2)
    out_ref[1] = to_u8(g2)
    out_ref[2] = to_u8(b2)


def _dct_matrix(ps):
    """Orthonormal DCT-II matrix used by cv2.dct (D = C X C^T)."""
    kf = jnp.arange(ps, dtype=jnp.float32)[:, None]
    jf = jnp.arange(ps, dtype=jnp.float32)[None, :]
    c = jnp.sqrt(2.0 / ps) * jnp.cos(jnp.pi * kf * (2.0 * jf + 1.0) / (2.0 * ps))
    return c.at[0, :].set(1.0 / jnp.sqrt(jnp.float32(ps)))


def _spatial_pattern(ps, magnitude):
    """magnitude * IDCT(E_{ps-1,ps-1} + E_{ps//2-1,ps//2-1}) -- the per-block trigger."""
    c = _dct_matrix(ps)
    hi = c[ps - 1]
    mid = c[ps // 2 - 1]
    return magnitude * (jnp.outer(hi, hi) + jnp.outer(mid, mid))  # (ps, ps) f32


def _num_tensorcores():
    """2 on v7x-class parts (2 TCs/chip), else 1.  Heuristic on device_kind."""
    try:
        kind = jax.devices()[0].device_kind.lower().replace(" ", "")
    except Exception:  # pragma: no cover - defensive
        return 1
    return 2 if ("v7" in kind or "7x" in kind) else 1


def _pick_row_block(H, W, ps, batch, num_cores, budget_bytes):
    """Rows per grid step.

    Multiple of ps (pattern tiling) and ideally of 32 (u8 sublane packing); sized so the
    double-buffered u8 I/O, the f32 pattern and the ~10 live (rows, W) f32 elementwise
    temporaries fit `budget_bytes`.  Single-TC parts (v5e/v6e) just take the largest
    fitting block (fewer grid steps = less per-step overhead); 2-TC parts (v7x) prefer a
    total grid that splits evenly across cores.
    """
    unit = 0
    for m in (32, 16, 8):
        u = ps * m // math.gcd(ps, m)
        if H % u == 0:
            unit = u
            break
    if unit == 0 or unit >= H:
        return H  # full-extent row block is always layout-legal
    # bytes/row: u8 in+out double-buffered (12W) + f32 pattern double-buffered (8W)
    # + ~10 live f32 (rows, W) temporaries of the elementwise chain (40W).
    per_row = 60 * W
    cap = max(unit, budget_bytes // per_row)
    cands = [t for t in range(unit, min(H, cap) + 1, unit) if H % t == 0]
    if not cands:
        cands = [unit]
    if num_cores > 1:
        even = [t for t in cands if (batch * (H // t)) % num_cores == 0]
        if even:
            cands = even
    return max(cands)


def frequency_based_trigger(img_u8, *, patch_size, magnitude, ratio=1.0):
    """Planar uint8 image(s): (3, H, W) or (N, 3, H, W) -> same shape, uint8.

    Keeping the data planar end-to-end avoids the two full-HBM-pass HWC<->CHW transposes
    (which would move ~2x the kernel's own traffic).  For best store throughput W should
    be a multiple of 128 (lane-dense), but any W works.  `ratio` is accepted and ignored,
    exactly like the reference forward.
    """
    del ratio  # reference forward ignores it
    squeeze = img_u8.ndim == 3
    if squeeze:
        img_u8 = img_u8[None]
    N, C, H, W = img_u8.shape
    ps = int(patch_size)
    assert C == 3 and H % ps == 0 and W % ps == 0
    assert img_u8.dtype == jnp.uint8

    num_cores = _num_tensorcores()
    TR = _pick_row_block(H, W, ps, N, num_cores, budget_bytes=32 * 1024 * 1024)

    pattern = _spatial_pattern(ps, float(magnitude))                          # (ps, ps)
    pattern_blk = jnp.tile(pattern, (TR // ps, W // ps)).astype(jnp.float32)  # (TR, W)

    # Fold batch into the channel-plane axis: (N,3,H,W) -> (N*3,H,W) is a free reshape,
    # and a (3, TR, W) block with first-dim block index n selects image n's three planes.
    img_flat = img_u8.reshape(N * 3, H, W)

    out_flat = pl.pallas_call(
        _freq_trigger_kernel,
        out_shape=jax.ShapeDtypeStruct((N * 3, H, W), jnp.uint8),
        grid=(N, H // TR),
        in_specs=[
            pl.BlockSpec((3, TR, W), lambda n, i: (n, i, 0)),   # u8 planes of image n
            pl.BlockSpec((TR, W), lambda n, i: (0, 0)),         # constant block -> one DMA
        ],
        out_specs=pl.BlockSpec((3, TR, W), lambda n, i: (n, i, 0)),
        compiler_params=pltpu.CompilerParams(
            dimension_semantics=("parallel", "parallel"),
            vmem_limit_bytes=48 * 1024 * 1024,
        ),
    )(img_flat, pattern_blk)

    out = out_flat.reshape(N, 3, H, W)
    return out[0] if squeeze else out


def frequency_based_trigger_hwc(img_hwc_u8, *, patch_size, magnitude, ratio=1.0):
    """(H, W, 3) uint8 -> (H, W, 3) uint8.  Drop-in for the PIL/HWC reference layout.

    Note: the two uint8 transposes here cost ~2x the kernel's HBM traffic -- prefer the
    planar `frequency_based_trigger` (or fuse these transposes into the caller's pipeline).
    """
    chw = jnp.transpose(img_hwc_u8, (2, 0, 1))
    out = frequency_based_trigger(chw, patch_size=patch_size, magnitude=magnitude, ratio=ratio)
    return jnp.transpose(out, (1, 2, 0))


def _reference_jnp(img_nchw_u8, ps, magnitude):
    """Plain-JAX version of the same math (planar NCHW), to validate the Pallas plumbing."""
    x = img_nchw_u8.astype(jnp.float32)
    r, g, b = x[:, 0], x[:, 1], x[:, 2]
    y = 0.299 * r + 0.587 * g + 0.114 * b
    cr = jnp.floor((r - y) * 0.713 + 128.5)
    cb = jnp.floor((b - y) * 0.564 + 128.5)
    y = jnp.floor(y + 0.5)
    _, _, H, W = img_nchw_u8.shape
    patt = jnp.tile(_spatial_pattern(ps, magnitude), (H // ps, W // ps))
    cr = ((cr + patt).astype(jnp.int32) & 255).astype(jnp.float32)
    cb = ((cb + patt).astype(jnp.int32) & 255).astype(jnp.float32)
    crd, cbd = cr - 128.0, cb - 128.0
    yh = y + 0.5
    r2 = yh + 1.403 * crd
    g2 = yh - 0.714 * crd - 0.344 * cbd
    b2 = yh + 1.773 * cbd
    to_u8 = lambda v: jnp.clip(v, 0.0, 255.0).astype(jnp.uint8)
    return jnp.stack([to_u8(r2), to_u8(g2), to_u8(b2)], axis=1)


if __name__ == "__main__":
    patch_size = 16
    magnitude = 30.0
    N, H, W = 2, 64, 128   # W multiple of 128 -> lane-dense uint8 stores

    key = jax.random.PRNGKey(0)
    img = jax.random.randint(key, (N, 3, H, W), 0, 256, dtype=jnp.int32).astype(jnp.uint8)

    out = frequency_based_trigger(img, patch_size=patch_size, magnitude=magnitude, ratio=1.0)
    out = jax.block_until_ready(out)
    assert out.shape == (N, 3, H, W) and out.dtype == jnp.uint8

    ref = jax.block_until_ready(_reference_jnp(img, patch_size, magnitude))
    max_diff = int(jnp.max(jnp.abs(out.astype(jnp.int32) - ref.astype(jnp.int32))))
    assert max_diff <= 1, f"pallas vs jnp reference mismatch: max |diff| = {max_diff}"

    # HWC compatibility wrapper matches the planar result (just transposed).
    out_hwc = jax.block_until_ready(
        frequency_based_trigger_hwc(
            jnp.transpose(img[0], (1, 2, 0)), patch_size=patch_size, magnitude=magnitude
        )
    )
    assert bool(jnp.array_equal(out_hwc, jnp.transpose(out[0], (1, 2, 0))))

    print("KERNEL_OK")
</pallas_src>

<mosaic_0001>
module attributes {stable_mosaic.version = 11 : i64} {
  func.func @_freq_trigger_kernel(%arg0: i32, %arg1: i32, %arg2: memref<3x64x128xi8, #tpu.memory_space<vmem>>, %arg3: memref<64x128xf32, #tpu.memory_space<vmem>>, %arg4: memref<3x64x128xi8, #tpu.memory_space<vmem>>) attributes {dimension_semantics = [#tpu.dimension_semantics<parallel>, #tpu.dimension_semantics<parallel>], iteration_bounds = array<i64: 2, 1>, scalar_prefetch = 0 : i64, scratch_operands = 0 : i64, tpu.core_type = #tpu.core_type<tc>, window_params = [{transform_indices = @transform_0, window_bounds = array<i64: 3, 64, 128>}, {pipeline_mode = #tpu.pipeline_mode<synchronous>, transform_indices = @transform_1, window_bounds = array<i64: 64, 128>}, {transform_indices = @transform_2, window_bounds = array<i64: 3, 64, 128>}]} {
    %c0 = arith.constant 0 : index
    %c0_0 = arith.constant 0 : index
    %c0_1 = arith.constant 0 : index
    %0 = vector.load %arg2[%c0, %c0_0, %c0_1] : memref<3x64x128xi8, #tpu.memory_space<vmem>>, vector<1x64x128xi8>
    %1 = vector.shape_cast %0 : vector<1x64x128xi8> to vector<64x128xi8>
    %2 = arith.extui %1 : vector<64x128xi8> to vector<64x128xi32>
    %3 = arith.sitofp %2 : vector<64x128xi32> to vector<64x128xf32>
    %c1 = arith.constant 1 : index
    %c0_2 = arith.constant 0 : index
    %c0_3 = arith.constant 0 : index
    %4 = vector.load %arg2[%c1, %c0_2, %c0_3] : memref<3x64x128xi8, #tpu.memory_space<vmem>>, vector<1x64x128xi8>
    %5 = vector.shape_cast %4 : vector<1x64x128xi8> to vector<64x128xi8>
    %6 = arith.extui %5 : vector<64x128xi8> to vector<64x128xi32>
    %7 = arith.sitofp %6 : vector<64x128xi32> to vector<64x128xf32>
    %c2 = arith.constant 2 : index
    %c0_4 = arith.constant 0 : index
    %c0_5 = arith.constant 0 : index
    %8 = vector.load %arg2[%c2, %c0_4, %c0_5] : memref<3x64x128xi8, #tpu.memory_space<vmem>>, vector<1x64x128xi8>
    %9 = vector.shape_cast %8 : vector<1x64x128xi8> to vector<64x128xi8>
    %10 = arith.extui %9 : vector<64x128xi8> to vector<64x128xi32>
    %11 = arith.sitofp %10 : vector<64x128xi32> to vector<64x128xf32>
    %cst = arith.constant 2.990000e-01 : f32
    %12 = vector.broadcast %cst : f32 to vector<64x128xf32>
    %13 = arith.mulf %12, %3 : vector<64x128xf32>
    %cst_6 = arith.constant 5.870000e-01 : f32
    %14 = vector.broadcast %cst_6 : f32 to vector<64x128xf32>
    %15 = arith.mulf %14, %7 : vector<64x128xf32>
    %16 = arith.addf %13, %15 : vector<64x128xf32>
    %cst_7 = arith.constant 1.140000e-01 : f32
    %17 = vector.broadcast %cst_7 : f32 to vector<64x128xf32>
    %18 = arith.mulf %17, %11 : vector<64x128xf32>
    %19 = arith.addf %16, %18 : vector<64x128xf32>
    %20 = arith.subf %3, %19 : vector<64x128xf32>
    %cst_8 = arith.constant 0.712999999 : f32
    %21 = vector.broadcast %cst_8 : f32 to vector<64x128xf32>
    %22 = arith.mulf %20, %21 : vector<64x128xf32>
    %cst_9 = arith.constant 1.285000e+02 : f32
    %23 = vector.broadcast %cst_9 : f32 to vector<64x128xf32>
    %24 = arith.addf %22, %23 : vector<64x128xf32>
    %25 = math.floor %24 : vector<64x128xf32>
    %26 = arith.subf %11, %19 : vector<64x128xf32>
    %cst_10 = arith.constant 5.640000e-01 : f32
    %27 = vector.broadcast %cst_10 : f32 to vector<64x128xf32>
    %28 = arith.mulf %26, %27 : vector<64x128xf32>
    %cst_11 = arith.constant 1.285000e+02 : f32
    %29 = vector.broadcast %cst_11 : f32 to vector<64x128xf32>
    %30 = arith.addf %28, %29 : vector<64x128xf32>
    %31 = math.floor %30 : vector<64x128xf32>
    %cst_12 = arith.constant 5.000000e-01 : f32
    %32 = vector.broadcast %cst_12 : f32 to vector<64x128xf32>
    %33 = arith.addf %19, %32 : vector<64x128xf32>
    %34 = math.floor %33 : vector<64x128xf32>
    %c0_13 = arith.constant 0 : index
    %c0_14 = arith.constant 0 : index
    %35 = vector.load %arg3[%c0_13, %c0_14] : memref<64x128xf32, #tpu.memory_space<vmem>>, vector<64x128xf32>
    %36 = arith.addf %25, %35 : vector<64x128xf32>
    %37 = arith.fptosi %36 : vector<64x128xf32> to vector<64x128xi32>
    %c255_i32 = arith.constant 255 : i32
    %38 = vector.broadcast %c255_i32 : i32 to vector<64x128xi32>
    %39 = arith.andi %37, %38 : vector<64x128xi32>
    %40 = arith.sitofp %39 : vector<64x128xi32> to vector<64x128xf32>
    %41 = arith.addf %31, %35 : vector<64x128xf32>
    %42 = arith.fptosi %41 : vector<64x128xf32> to vector<64x128xi32>
    %c255_i32_15 = arith.constant 255 : i32
    %43 = vector.broadcast %c255_i32_15 : i32 to vector<64x128xi32>
    %44 = arith.andi %42, %43 : vector<64x128xi32>
    %45 = arith.sitofp %44 : vector<64x128xi32> to vector<64x128xf32>
    %cst_16 = arith.constant 1.280000e+02 : f32
    %46 = vector.broadcast %cst_16 : f32 to vector<64x128xf32>
    %47 = arith.subf %40, %46 : vector<64x128xf32>
    %cst_17 = arith.constant 1.280000e+02 : f32
    %48 = vector.broadcast %cst_17 : f32 to vector<64x128xf32>
    %49 = arith.subf %45, %48 : vector<64x128xf32>
    %cst_18 = arith.constant 5.000000e-01 : f32
    %50 = vector.broadcast %cst_18 : f32 to vector<64x128xf32>
    %51 = arith.addf %34, %50 : vector<64x128xf32>
    %cst_19 = arith.constant 1.403000e+00 : f32
    %52 = vector.broadcast %cst_19 : f32 to vector<64x128xf32>
    %53 = arith.mulf %52, %47 : vector<64x128xf32>
    %54 = arith.addf %51, %53 : vector<64x128xf32>
    %cst_20 = arith.constant 7.140000e-01 : f32
    %55 = vector.broadcast %cst_20 : f32 to vector<64x128xf32>
    %56 = arith.mulf %55, %47 : vector<64x128xf32>
    %57 = arith.subf %51, %56 : vector<64x128xf32>
    %cst_21 = arith.constant 3.440000e-01 : f32
    %58 = vector.broadcast %cst_21 : f32 to vector<64x128xf32>
    %59 = arith.mulf %58, %49 : vector<64x128xf32>
    %60 = arith.subf %57, %59 : vector<64x128xf32>
    %cst_22 = arith.constant 1.773000e+00 : f32
    %61 = vector.broadcast %cst_22 : f32 to vector<64x128xf32>
    %62 = arith.mulf %61, %49 : vector<64x128xf32>
    %63 = arith.addf %51, %62 : vector<64x128xf32>
    %cst_23 = arith.constant 0.000000e+00 : f32
    %cst_24 = arith.constant 2.550000e+02 : f32
    %64 = vector.broadcast %cst_23 : f32 to vector<64x128xf32>
    %65 = arith.maximumf %64, %54 : vector<64x128xf32>
    %66 = vector.broadcast %cst_24 : f32 to vector<64x128xf32>
    %67 = arith.minimumf %66, %65 : vector<64x128xf32>
    %68 = arith.fptosi %67 : vector<64x128xf32> to vector<64x128xi32>
    %69 = arith.trunci %68 : vector<64x128xi32> to vector<64x128xi8>
    %c0_25 = arith.constant 0 : index
    %c0_26 = arith.constant 0 : index
    %c0_27 = arith.constant 0 : index
    %70 = vector.load %arg4[%c0_25, %c0_26, %c0_27] : memref<3x64x128xi8, #tpu.memory_space<vmem>>, vector<1x64x128xi8>
    %71 = vector.shape_cast %70 : vector<1x64x128xi8> to vector<64x128xi8>
    %72 = vector.shape_cast %69 : vector<64x128xi8> to vector<1x64x128xi8>
    tpu.vector_store %arg4[%c0_25, %c0_26, %c0_27], %72 {strides = array<i32>} : memref<3x64x128xi8, #tpu.memory_space<vmem>>, vector<1x64x128xi8>,
    %cst_28 = arith.constant 0.000000e+00 : f32
    %cst_29 = arith.constant 2.550000e+02 : f32
    %73 = vector.broadcast %cst_28 : f32 to vector<64x128xf32>
    %74 = arith.maximumf %73, %60 : vector<64x128xf32>
    %75 = vector.broadcast %cst_29 : f32 to vector<64x128xf32>
    %76 = arith.minimumf %75, %74 : vector<64x128xf32>
    %77 = arith.fptosi %76 : vector<64x128xf32> to vector<64x128xi32>
    %78 = arith.trunci %77 : vector<64x128xi32> to vector<64x128xi8>
    %c1_30 = arith.constant 1 : index
    %c0_31 = arith.constant 0 : index
    %c0_32 = arith.constant 0 : index
    %79 = vector.load %arg4[%c1_30, %c0_31, %c0_32] : memref<3x64x128xi8, #tpu.memory_space<vmem>>, vector<1x64x128xi8>
    %80 = vector.shape_cast %79 : vector<1x64x128xi8> to vector<64x128xi8>
    %81 = vector.shape_cast %78 : vector<64x128xi8> to vector<1x64x128xi8>
    tpu.vector_store %arg4[%c1_30, %c0_31, %c0_32], %81 {strides = array<i32>} : memref<3x64x128xi8, #tpu.memory_space<vmem>>, vector<1x64x128xi8>,
    %cst_33 = arith.constant 0.000000e+00 : f32
    %cst_34 = arith.constant 2.550000e+02 : f32
    %82 = vector.broadcast %cst_33 : f32 to vector<64x128xf32>
    %83 = arith.maximumf %82, %63 : vector<64x128xf32>
    %84 = vector.broadcast %cst_34 : f32 to vector<64x128xf32>
    %85 = arith.minimumf %84, %83 : vector<64x128xf32>
    %86 = arith.fptosi %85 : vector<64x128xf32> to vector<64x128xi32>
    %87 = arith.trunci %86 : vector<64x128xi32> to vector<64x128xi8>
    %c2_35 = arith.constant 2 : index
    %c0_36 = arith.constant 0 : index
    %c0_37 = arith.constant 0 : index
    %88 = vector.load %arg4[%c2_35, %c0_36, %c0_37] : memref<3x64x128xi8, #tpu.memory_space<vmem>>, vector<1x64x128xi8>
    %89 = vector.shape_cast %88 : vector<1x64x128xi8> to vector<64x128xi8>
    %90 = vector.shape_cast %87 : vector<64x128xi8> to vector<1x64x128xi8>
    tpu.vector_store %arg4[%c2_35, %c0_36, %c0_37], %90 {strides = array<i32>} : memref<3x64x128xi8, #tpu.memory_space<vmem>>, vector<1x64x128xi8>,
    return
  }
  func.func @transform_0(%arg0: i32, %arg1: i32) -> (i32, i32, i32) {
    %c0_i32 = arith.constant 0 : i32
    %c0_i32_0 = arith.constant 0 : i32
    return %arg0, %arg1, %c0_i32 : i32, i32, i32
  }
  func.func @transform_1(%arg0: i32, %arg1: i32) -> (i32, i32) {
    %c0_i32 = arith.constant 0 : i32
    %c0_i32_0 = arith.constant 0 : i32
    %c0_i32_1 = arith.constant 0 : i32
    return %c0_i32, %c0_i32_0 : i32, i32
  }
  func.func @transform_2(%arg0: i32, %arg1: i32) -> (i32, i32, i32) {
    %c0_i32 = arith.constant 0 : i32
    %c0_i32_0 = arith.constant 0 : i32
    return %arg0, %arg1, %c0_i32 : i32, i32, i32
  }
}

</mosaic_0001>

<bundles_post_ra>
// kernel: tpu_custom_call.1
= control target key start
LH: loop header
LB: loop body
LE: loop exit
PB: predicated region body
PF: predicated region fallthrough
CT: control target
= control target key end

     0   :  { %7 = vsyncpa [#allocation3], 0  ;;  %s1588_s0 = inlined_call_operand.hbm [shape: u8[6,64,128], index: 0, kind: input, shape index: {}]   ;;  %s1589_s1 = inlined_call_operand.hbm [shape: f32[64,128], index: 1, kind: input, shape index: {}]   ;;  %s1590_s2 = inlined_call_operand.hbm [shape: u8[6,64,128], index: 2, kind: output, shape index: {}]  }
   0x1   :  { %9 = vsyncpa [#allocation3 + $0x1], 0 }
   0x2   :  { %10 = vsyncpa [#allocation6], 0 }
   0x3   :  { %11 = vsyncpa [#allocation4], 0 }
   0x4   :  { %13 = vsyncpa [#allocation4 + $0x1], 0  ;;  %s1136_s9 = smov 0   ;;  %s1138_s10 = smov 0  }
   0x5   :  { %s1140_s11 = smov 0   ;;  %s1142_s12 = smov 0  }
   0x6   :  { %s1144_s13 = smov 0   ;;  %s1146_s14 = smov 0  }
   0x7 LB: > { %s772_s15 = sadd.s32 4294967295, %s1112_s14   ;;  %s773_s16 = sadd.s32 4294967294, %s1112_s14   ;;  %s1112_s14 = sphi %s1146_s14, %s19_s14   ;;  %s1108_s13 = sphi %s1144_s13, %s1610_s13   ;;  %s1104_s12 = sphi %s1142_s12, %s1609_s12   ;;  %s1100_s11 = sphi %s1140_s11, %s1608_s11   ;;  %s1096_s10 = sphi %s1138_s10, %s1607_s10   ;;  %s1092_s9 = sphi %s1136_s9, %s1606_s9  }
   0x8   : > { %p53_p0 = scmp.ne.s32.totalorder %s1096_s10, %s1092_s9  ;;  %p1170_p1 = scmp.eq.s32.totalorder %s772_s15, 0 }
   0x9   : > { %p1174_p2 = scmp.eq.s32.totalorder %s772_s15, 1  ;;  %p106_p3 = scmp.eq.s32.totalorder %s773_s16, 1 }
   0xa   : > { %p1180_p4 = por %p1170_p1, %p53_p0  ;;  %p774_p5 = scmp.ge.s32.totalorder %s1112_s14, 1 }
   0xb   : > { %p1185_p6 = por %p106_p3, %p53_p0  ;;  %p113_p7 = scmp.lt.s32.totalorder %s1112_s14, 3 }
   0xc   : > { %s1596_s19 = scalar_select %p1180_p4, 1, 0 }
   0xd   : > { %s1597_s20 = scalar_select %p1185_p6, 1, 0 }
   0xe   : > { %p1190_p8 = pnand %p774_p5, %p113_p7  ;;  %s1114_s22 = smov [#allocation5]  }
   0xf   : > { %s125_s23 = sshll.u32 %s1114_s22, 4  ;;  %p776_p10 = scmp.ge.s32.totalorder %s1112_s14, 2  ;;  %s126_s23 = int_to_ptr.vmem [resolvable:$true] %s125_s23 }
  0x10   : > { %p905_p9 = pneg %p1190_p8  ;;  %s31_s25 = sadd.s32 1, %s1108_s13 }
  0x11   : > { %s985_s26 = scalar_lea.vmem %s126_s23, 1024  ;;  %p993_p5 = scmp.lt.s32.totalorder %s126_s23, %s126_s23 }
  0x12   : > { %p1199_p11 = pnand %p905_p9, %p1170_p1  ;;  %p986_p13 = scmp.ne.s32.totalorder %s126_s23, %s985_s26 }
  0x13   : > { %p994_p7 = scmp.lt.s32.totalorder %s985_s26, %s985_s26 }
  0x14   : > { %p976_p12 = pneg %p1199_p11 }
  0x15   : > { %p995_p6 = por %p994_p7, %p993_p5 }
  0x16   : > { %p988_p0 = pnand %p986_p13, %p976_p12 }
  0x18   : > { %p989_p3 = pneg %p988_p0 }
  0x1a   : > { %p996_p4 = pnand %p995_p6, %p989_p3 }
  0x1c   : > { %999 = shalt.err (!%p996_p4)
}
  0x1d   : > { %s1115_s27 = smov 128   ;;  %s1116_s28 = smov 8  }
  0x1e   : > { %908 = dma.hbm_to_vmem [thread:$0]  (!%p1199_p11), %s1589_s1, 1024, %s126_s23, [#allocation6], %s1115_s27, %s1115_s27, %s1116_s28  }
  0x1f   : > { %p33_p4 = scmp.ge.s32.totalorder %s31_s25, 2  ;;  %s40_s3 = sadd.s32 1, %s1100_s11 }
  0x20   : > { %p47_p6 = scmp.ne.s32.totalorder %s1100_s11, %s1096_s10  ;;  %p48_p9 = scmp.eq.s32.totalorder %s1112_s14, 0 }
  0x21   : > { %s1612_s25 = smov (%p33_p4, %s31_s25), 0  ;;  %p918_p0 = scmp.lt.s32.totalorder %s1112_s14, 2 }
  0x22   : > { %p49_p12 = por %p48_p9, %p47_p6  ;;  %p1222_p13 = por %p1174_p2, %p47_p6 }
  0x23   : > { %s35_s5 = ssub.s32 %s1108_s13, %s1612_s25  ;;  %s139_s6 = sand.u32 1, %s1100_s11  }
  0x24   : > { %p38_p3 = scmp.eq.s32.totalorder %s35_s5, 0  ;;  %s815_s7 = smul.u32 48, %s139_s6 }
  0x25   : > { %s813_s15 = smul.u32 768, %s1108_s13  ;;  %p1234_p11 = pnand %p918_p0, %p49_p12 }
  0x26   : > { %s1231_s8 = scalar_select %p38_p3, %s1100_s11, %s40_s3  }
  0x27   : > { %s143_s16 = scalar_lea.vmem [#allocation2], %s815_s7  ;;  %s152_s26 = scalar_lea.hbm %s1588_s0, %s813_s15 }
  0x28   : > { %s153_s22 = sshll.u32 %s143_s16, 4  ;;  %s140_s29 = scalar_lea.sflag [#allocation3], %s139_s6  ;;  %s154_s22 = int_to_ptr.vmem [resolvable:$true] %s153_s22 }
  0x29   : > { %p1002_p2 = pneg %p1234_p11  ;;  %s1013_s30 = scalar_lea.vmem %s154_s22, 768 }
  0x2a   : > { %p1014_p5 = scmp.ne.s32.totalorder %s154_s22, %s1013_s30  ;;  %s1117_s3 = smov [#allocation2]  }
  0x2b   : > { %s1018_s5 = sshll.u32 %s1117_s3, 4  ;;  %s1019_s5 = int_to_ptr.vmem [resolvable:$false] %s1018_s5 }
  0x2c   : > { %p1016_p7 = pnand %p1014_p5, %p1002_p2  ;;  %s1020_s7 = scalar_lea.vmem %s1019_s5, 1536 }
  0x2d   : > { %p1021_p6 = scmp.lt.s32.totalorder %s154_s22, %s1019_s5  ;;  %p1022_p9 = scmp.lt.s32.totalorder %s1020_s7, %s1013_s30 }
  0x2e   : > { %p1017_p4 = pneg %p1016_p7 }
  0x2f   : > { %p1023_p12 = por %p1022_p9, %p1021_p6 }
  0x31   : > { %p1024_p0 = pnand %p1023_p12, %p1017_p4 }
  0x33   : > { %1027 = shalt.err (!%p1024_p0)
}
  0x34   : > { %912 = dma.hbm_to_vmem [thread:$0]  (!%p1234_p11), %s152_s26, 768, %s154_s22, %s140_s29, %s1115_s27, %s1115_s27, %s1116_s28  }
  0x35   : > { %165 = sbr.rel (%p1190_p8) target bundleno = 203 (0xcb), region = 28  ;;  %s1251_s6 = sand.u32 (!%p1190_p8), 1, %s1096_s10  }
  0x36   : > { %s816_s15 = smul.u32 (!%p1190_p8), 48, %s1251_s6  ;;  %s168_s16 = scalar_lea.sflag (!%p1190_p8), [#allocation3], %s1251_s6 }
  0x37   : > { %p1602_p3 = scmp.ne.s32.totalorder (!%p1190_p8), %s1596_s19, 0 }
  0x38   : > { %s1257_s24 = scalar_lea.vmem (!%p1190_p8), [#allocation2], %s816_s15 }
  0x3a   : > { %1079 = dma.done.wait (%p1602_p3), %s168_s16, 768  }
  0x3b   : > { %1081 = vsyncadd (%p1602_p3), %s168_s16, 4294966528 }
  0x3c   : > { %1083 = dma.done.wait (%p1170_p1), [#allocation6], 1024  }
  0x3d   : > { %1085 = vsyncadd (%p1170_p1), [#allocation6], 4294966272  ;;  %v200_v0 = vld [vmem:[%s1257_s24] sm:$0xff]  ;;  %v781_v1 = vld [vmem:[%s1257_s24 + $0x10] sm:$0xff]  ;;  %s1425_s17 = scalar_lea.vmem [#allocation7], %s816_s15  ;;  %s814_s21 = smul.u32 768, %s1104_s12 }
  0x3e   : > { %v202_v2 = vunpack.c.0.s8 %v200_v0  ;;  %v203_v3 = vunpack.c.1.s8 %v200_v0  ;;  %v204_v4 = vunpack.c.2.s8 %v200_v0  ;;  %v205_v5 = vunpack.c.3.s8 %v200_v0  ;;  %v783_v18 = vld [vmem:[%s1257_s24 + $0x20] sm:$0xff]  ;;  %v201_v23 = vld [vmem:[%s1257_s24 + $0x8] sm:$0xff]  ;;  %s675_s19 = sshll.u32 %s1425_s17, 4  ;;  %s659_s23 = scalar_lea.sflag [#allocation4], %s1251_s6  ;;  %s1534_s19 = int_to_ptr.vmem [resolvable:$true] %s675_s19 }
  0x3f   : > { %v229_v6 = vunpack.c.0.s8 %v781_v1  ;;  %v230_v7 = vunpack.c.1.s8 %v781_v1  ;;  %v231_v8 = vunpack.c.2.s8 %v781_v1  ;;  %v232_v9 = vunpack.c.3.s8 %v781_v1  ;;  %s1539_s22 = scalar_lea.hbm %s1590_s2, %s814_s21  ;;  %s1028_s18 = scalar_lea.vmem %s1534_s19, 768 }
  0x40   : > { %v210_v10 = vand.u32 255, %v202_v2  ;;  %v211_v11 = vand.u32 255, %v203_v3  ;;  %v212_v12 = vand.u32 255, %v204_v4  ;;  %v213_v13 = vand.u32 255, %v205_v5  ;;  %p1029_p1 = scmp.ne.s32.totalorder %s1534_s19, %s1028_s18  ;;  %s1118_s12 = smov [#allocation7]  }
  0x41   : > { %v237_v14 = vand.u32 255, %v229_v6  ;;  %v238_v15 = vand.u32 255, %v230_v7  ;;  %v239_v16 = vand.u32 255, %v231_v8  ;;  %v240_v17 = vand.u32 255, %v232_v9  ;;  %s1032_s26 = sshll.u32 %s1118_s12, 4  ;;  %s1033_s26 = int_to_ptr.vmem [resolvable:$false] %s1032_s26 }
  0x42   : > { %v218_v19 = vcvt.s32.f32 %v210_v10  ;;  %v219_v20 = vcvt.s32.f32 %v211_v11  ;;  %v220_v21 = vcvt.s32.f32 %v212_v12  ;;  %v221_v22 = vcvt.s32.f32 %v213_v13  ;;  %p1030_p8 = pnand %p1029_p1, %p1222_p13  ;;  %s1034_s29 = scalar_lea.vmem %s1033_s26, 1536 }
  0x43   : > { %v245_v24 = vcvt.s32.f32 %v237_v14  ;;  %v246_v25 = vcvt.s32.f32 %v238_v15  ;;  %v247_v26 = vcvt.s32.f32 %v239_v16  ;;  %v248_v27 = vcvt.s32.f32 %v240_v17  ;;  %p1035_p2 = scmp.lt.s32.totalorder %s1534_s19, %s1033_s26  ;;  %p1036_p5 = scmp.lt.s32.totalorder %s1034_s29, %s1028_s18 }
  0x44   : > { %v256_v28 = vunpack.c.0.s8 %v783_v18  ;;  %v257_v29 = vunpack.c.1.s8 %v783_v18  ;;  %v258_v30 = vunpack.c.2.s8 %v783_v18  ;;  %v259_v31 = vunpack.c.3.s8 %v783_v18  ;;  %p1031_p11 = pneg %p1030_p8 }
  0x45   : > { %v280_v32 = vmul.f32 0.299, %v218_v19  ;;  %v281_v33 = vmul.f32 0.299, %v219_v20  ;;  %v282_v34 = vmul.f32 0.299, %v220_v21  ;;  %v206_v35 = vunpack.c.0.s8 %v201_v23  ;;  %p1037_p7 = por %p1036_p5, %p1035_p2 }
  0x46   : > { %v1271_v36 = vand.u32 255, %v256_v28  ;;  %v1273_v37 = vand.u32 255, %v257_v29  ;;  %v1275_v38 = vand.u32 255, %v258_v30  ;;  %v1277_v39 = vand.u32 255, %v259_v31  ;;  %v782_v30 = vld [vmem:[%s1257_s24 + $0x18] sm:$0xff] }
  0x47   : > { %v283_v40 = vmul.f32 0.299, %v221_v22  ;;  %v288_v41 = vmul.f32 0.587, %v245_v24  ;;  %v289_v42 = vmul.f32 0.587, %v246_v25  ;;  %v207_v43 = vunpack.c.1.s8 %v201_v23  ;;  %p1038_p4 = pnand %p1037_p7, %p1031_p11 }
  0x48   : > { %v272_v44 = vcvt.s32.f32 %v1271_v36  ;;  %v273_v45 = vcvt.s32.f32 %v1273_v37  ;;  %v1593_v46 = vcvt.s32.f32 %v1275_v38  ;;  %v1592_v47 = vcvt.s32.f32 %v1277_v39  ;;  %v1315_v24 = vld [vmem:[#allocation5] sm:$0xff] }
  0x49   : > { %v290_v48 = vmul.f32 0.587, %v247_v26  ;;  %v291_v49 = vmul.f32 0.587, %v248_v27  ;;  %v296_v50 = vadd.f32 %v288_v41, %v280_v32  ;;  %v297_v51 = vadd.f32 %v289_v42, %v281_v33  ;;  %v1321_v27 = vld [vmem:[#allocation5 + $0x8] sm:$0xff]  ;;  %v1328_v33 = vld [vmem:[#allocation5 + $0x10] sm:$0xff] }
  0x4a   : > { %v304_v52 = vmul.f32 0.114, %v272_v44  ;;  %v305_v53 = vmul.f32 0.114, %v273_v45  ;;  %v306_v54 = vmul.f32 0.114, %v1593_v46  ;;  %v208_v55 = vunpack.c.2.s8 %v201_v23 }
  0x4b   : > { %v298_v56 = vadd.f32 %v290_v48, %v282_v34  ;;  %v299_v57 = vadd.f32 %v291_v49, %v283_v40  ;;  %v307_v58 = vmul.f32 0.114, %v1592_v47  ;;  %v209_v59 = vunpack.c.3.s8 %v201_v23  ;;  %v1330_v34 = vld [vmem:[#allocation5 + $0x18] sm:$0xff] }
  0x4c   : > { %v1291_v60 = vadd.f32 %v304_v52, %v296_v50  ;;  %v1293_v61 = vadd.f32 %v305_v53, %v297_v51  ;;  %v1295_v62 = vand.u32 255, %v206_v35  ;;  %v1297_v63 = vand.u32 255, %v207_v43 }
  0x4d   : > { %v1299_v0 = vadd.f32 %v306_v54, %v298_v56  ;;  %v1301_v1 = vadd.f32 %v307_v58, %v299_v57  ;;  %v1303_v2 = vand.u32 255, %v208_v55  ;;  %v1305_v3 = vand.u32 255, %v209_v59 }
  0x4e   : > { %v320_v4 = vsub.f32 %v218_v19, %v1291_v60  ;;  %v321_v5 = vsub.f32 %v219_v20, %v1293_v61  ;;  %v384_v6 = vadd.f32 0.5, %v1291_v60  ;;  %v385_v7 = vadd.f32 0.5, %v1293_v61 }
  0x4f   : > { %v322_v8 = vsub.f32 %v220_v21, %v1299_v0  ;;  %v323_v9 = vsub.f32 %v221_v22, %v1301_v1  ;;  %v386_v10 = vadd.f32 0.5, %v1299_v0  ;;  %v387_v11 = vadd.f32 0.5, %v1301_v1 }
  0x50   : > { %v328_v12 = vmul.f32 0.713, %v320_v4  ;;  %v329_v13 = vmul.f32 0.713, %v321_v5  ;;  %v392_v14 = vfloor.f32 %v384_v6  ;;  %v393_v15 = vfloor.f32 %v385_v7 }
  0x51   : > { %v330_v16 = vmul.f32 0.713, %v322_v8  ;;  %v331_v17 = vmul.f32 0.713, %v323_v9  ;;  %v394_v18 = vfloor.f32 %v386_v10  ;;  %v395_v19 = vfloor.f32 %v387_v11  ;;  %v784_v9 = vld [vmem:[%s1257_s24 + $0x28] sm:$0xff] }
  0x52   : > { %v336_v20 = vadd.f32 128.5, %v328_v12  ;;  %v337_v23 = vadd.f32 128.5, %v329_v13  ;;  %v1317_v21 = vadd.f32 0.5, %v392_v14  ;;  %v1319_v22 = vadd.f32 0.5, %v393_v15 }
  0x53   : > { %v338_v25 = vadd.f32 128.5, %v330_v16  ;;  %v339_v26 = vadd.f32 128.5, %v331_v17  ;;  %v1323_v28 = vadd.f32 0.5, %v394_v18  ;;  %v1325_v29 = vadd.f32 0.5, %v395_v19 }
  0x54   : > { %v344_v31 = vfloor.f32 %v336_v20  ;;  %v345_v32 = vfloor.f32 %v337_v23  ;;  %v222_v35 = vcvt.s32.f32 %v1295_v62  ;;  %v223_v40 = vcvt.s32.f32 %v1297_v63 }
  0x55   : > { %v346_v41 = vfloor.f32 %v338_v25  ;;  %v347_v42 = vfloor.f32 %v339_v26  ;;  %v224_v43 = vcvt.s32.f32 %v1303_v2  ;;  %v225_v48 = vcvt.s32.f32 %v1305_v3 }
  0x56   : > { %v408_v49 = vadd.f32 %v1315_v24, %v344_v31  ;;  %v409_v50 = vadd.f32 %v1321_v27, %v345_v32  ;;  %v233_v51 = vunpack.c.0.s8 %v782_v30  ;;  %v234_v52 = vunpack.c.1.s8 %v782_v30 }
  0x57   : > { %v410_v53 = vadd.f32 %v1328_v33, %v346_v41  ;;  %v411_v54 = vadd.f32 %v1330_v34, %v347_v42  ;;  %v235_v55 = vunpack.c.2.s8 %v782_v30  ;;  %v236_v56 = vunpack.c.3.s8 %v782_v30 }
  0x58   : > { %v817_v57 = vtrunc.f32 %v408_v49  ;;  %v819_v58 = vtrunc.f32 %v409_v50  ;;  %v241_v59 = vand.u32 255, %v233_v51  ;;  %v242_v4 = vand.u32 255, %v234_v52 }
  0x59   : > { %v821_v5 = vtrunc.f32 %v410_v53  ;;  %v823_v6 = vtrunc.f32 %v411_v54  ;;  %v243_v7 = vand.u32 255, %v235_v55  ;;  %v244_v8 = vand.u32 255, %v236_v56 }
  0x5a   : > { %v818_v10 = vcvt.f32.s32 %v817_v57  ;;  %v820_v11 = vcvt.f32.s32 %v819_v58  ;;  %v249_v12 = vcvt.s32.f32 %v241_v59  ;;  %v250_v13 = vcvt.s32.f32 %v242_v4 }
  0x5b   : > { %v822_v14 = vcvt.f32.s32 %v821_v5  ;;  %v824_v15 = vcvt.f32.s32 %v823_v6  ;;  %v251_v16 = vcvt.s32.f32 %v243_v7  ;;  %v252_v17 = vcvt.s32.f32 %v244_v8 }
  0x5c   : > { %v424_v18 = vand.u32 255, %v818_v10  ;;  %v425_v19 = vand.u32 255, %v820_v11  ;;  %v260_v20 = vunpack.c.0.s8 %v784_v9  ;;  %v261_v23 = vunpack.c.1.s8 %v784_v9 }
  0x5d   : > { %v426_v25 = vand.u32 255, %v822_v14  ;;  %v427_v26 = vand.u32 255, %v824_v15  ;;  %v262_v30 = vunpack.c.2.s8 %v784_v9  ;;  %v263_v31 = vunpack.c.3.s8 %v784_v9 }
  0x5e   : > { %v432_v32 = vcvt.s32.f32 %v424_v18  ;;  %v433_v41 = vcvt.s32.f32 %v425_v19  ;;  %v1341_v42 = vand.u32 255, %v260_v20  ;;  %v1343_v49 = vand.u32 255, %v261_v23 }
  0x5f   : > { %v434_v50 = vcvt.s32.f32 %v426_v25  ;;  %v435_v51 = vcvt.s32.f32 %v427_v26  ;;  %v1345_v52 = vand.u32 255, %v262_v30  ;;  %v1347_v53 = vand.u32 255, %v263_v31 }
  0x60   : > { %v1349_v54 = vadd.f32 -128.0, %v432_v32  ;;  %v1351_v55 = vadd.f32 -128.0, %v433_v41  ;;  %v276_v56 = vcvt.s32.f32 %v1341_v42  ;;  %v277_v57 = vcvt.s32.f32 %v1343_v49 }
  0x61   : > { %v1355_v58 = vadd.f32 -128.0, %v434_v50  ;;  %v1357_v59 = vadd.f32 -128.0, %v435_v51  ;;  %v278_v4 = vcvt.s32.f32 %v1345_v52  ;;  %v279_v5 = vcvt.s32.f32 %v1347_v53 }
  0x62   : > { %v496_v6 = vmul.f32 1.403, %v1349_v54  ;;  %v497_v7 = vmul.f32 1.403, %v1351_v55  ;;  %v284_v8 = vmul.f32 0.299, %v222_v35  ;;  %v1368_v9 = vsub.f32 %v272_v44, %v1291_v60 }
  0x63   : > { %v498_v10 = vmul.f32 1.403, %v1355_v58  ;;  %v499_v11 = vmul.f32 1.403, %v1357_v59  ;;  %v285_v14 = vmul.f32 0.299, %v223_v40  ;;  %v1377_v15 = vsub.f32 %v273_v45, %v1293_v61 }
  0x64   : > { %v504_v18 = vadd.f32 %v496_v6, %v1317_v21  ;;  %v505_v19 = vadd.f32 %v497_v7, %v1319_v22  ;;  %v286_v36 = vmul.f32 0.299, %v224_v43  ;;  %v287_v44 = vmul.f32 0.299, %v225_v48 }
  0x65   : > { %v506_v60 = vadd.f32 %v498_v10, %v1323_v28  ;;  %v507_v20 = vadd.f32 %v499_v11, %v1325_v29  ;;  %v292_v23 = vmul.f32 0.587, %v249_v12  ;;  %v293_v25 = vmul.f32 0.587, %v250_v13 }
  0x66   : > { %v560_v26 = vmax.f32 %v504_v18, 0.0  ;;  %v561_v37 = vmax.f32 %v505_v19, 0.0  ;;  %v294_v45 = vmul.f32 0.587, %v251_v16  ;;  %v295_v61 = vmul.f32 0.587, %v252_v17 }
  0x67   : > { %v562_v30 = vmax.f32 %v506_v60, 0.0  ;;  %v563_v31 = vmax.f32 %v507_v20, 0.0  ;;  %v300_v32 = vadd.f32 %v292_v23, %v284_v8  ;;  %v301_v41 = vadd.f32 %v293_v25, %v285_v14 }
  0x68   : > { %v568_v50 = vmin.f32 %v560_v26, 255.0  ;;  %v569_v51 = vmin.f32 %v561_v37, 255.0  ;;  %v302_v6 = vadd.f32 %v294_v45, %v286_v36  ;;  %v303_v7 = vadd.f32 %v295_v61, %v287_v44 }
  0x69   : > { %v570_v47 = vmin.f32 %v562_v30, 255.0  ;;  %v571_v46 = vmin.f32 %v563_v31, 255.0  ;;  %v308_v10 = vmul.f32 0.114, %v276_v56  ;;  %v309_v12 = vmul.f32 0.114, %v277_v57 }
  0x6a   : > { %v849_v13 = vtrunc.f32 %v568_v50  ;;  %v851_v11 = vtrunc.f32 %v569_v51  ;;  %v310_v16 = vmul.f32 0.114, %v278_v4  ;;  %v311_v17 = vmul.f32 0.114, %v279_v5 }
  0x6b   : > { %v853_v8 = vtrunc.f32 %v570_v47  ;;  %v855_v14 = vtrunc.f32 %v571_v46  ;;  %v1395_v18 = vadd.f32 %v308_v10, %v300_v32  ;;  %v1397_v19 = vadd.f32 %v309_v12, %v301_v41  ;;  %v1419_v10 = vld [vmem:[#allocation5 + $0x20] sm:$0xff]  ;;  %v1421_v12 = vld [vmem:[#allocation5 + $0x28] sm:$0xff] }
  0x6c   : > { %v850_v36 = vcvt.f32.s32 %v849_v13  ;;  %v852_v44 = vcvt.f32.s32 %v851_v11  ;;  %v1399_v60 = vadd.f32 %v310_v16, %v302_v6  ;;  %v1401_v20 = vadd.f32 %v311_v17, %v303_v7  ;;  %v1428_v17 = vld [vmem:[#allocation5 + $0x30] sm:$0xff] }
  0x6d   : > { %v854_v23 = vcvt.f32.s32 %v853_v8  ;;  %v856_v25 = vcvt.f32.s32 %v855_v14  ;;  %v324_v26 = vsub.f32 %v222_v35, %v1395_v18  ;;  %v325_v46 = vsub.f32 %v223_v40, %v1397_v19  ;;  %v1430_v8 = vld [vmem:[#allocation5 + $0x38] sm:$0xff] }
  0x6e   : > { %v584_v47 = vpack.c.b16 %v852_v44, %v850_v36  ;;  %v326_v37 = vsub.f32 %v224_v43, %v1399_v60  ;;  %v327_v45 = vsub.f32 %v225_v48, %v1401_v20  ;;  %v388_v61 = vadd.f32 0.5, %v1395_v18 }
  0x6f   : > { %v585_v30 = vpack.c.b16 %v856_v25, %v854_v23  ;;  %v332_v31 = vmul.f32 0.713, %v324_v26  ;;  %v333_v32 = vmul.f32 0.713, %v325_v46  ;;  %v389_v62 = vadd.f32 0.5, %v1397_v19 }
  0x70   : > { %v334_v35 = vmul.f32 0.713, %v326_v37  ;;  %v335_v63 = vmul.f32 0.713, %v327_v45  ;;  %v390_v40 = vadd.f32 0.5, %v1399_v60  ;;  %v391_v41 = vadd.f32 0.5, %v1401_v20 }
  0x71   : > { %v586_v2 = vpack.c.b8 %v585_v30, %v584_v47  ;;  %v340_v43 = vadd.f32 128.5, %v332_v31  ;;  %v341_v50 = vadd.f32 128.5, %v333_v32  ;;  %v396_v51 = vfloor.f32 %v388_v61 }
  0x72   : > { %v342_v3 = vadd.f32 128.5, %v334_v35  ;;  %v343_v48 = vadd.f32 128.5, %v335_v63  ;;  %v397_v6 = vfloor.f32 %v389_v62  ;;  %v398_v7 = vfloor.f32 %v390_v40 }
  0x73   : > { %590 = vst [vmem:[%s1425_s17] sm:$0xff] %v586_v2  ;;  %v348_v13 = vfloor.f32 %v340_v43  ;;  %v349_v11 = vfloor.f32 %v341_v50  ;;  %v399_v16 = vfloor.f32 %v391_v41  ;;  %v1432_v14 = vadd.f32 0.5, %v396_v51 }
  0x74   : > { %v350_v36 = vfloor.f32 %v342_v3  ;;  %v351_v44 = vfloor.f32 %v343_v48  ;;  %v1434_v23 = vadd.f32 0.5, %v397_v6  ;;  %v1436_v25 = vadd.f32 0.5, %v398_v7 }
  0x75   : > { %v412_v26 = vadd.f32 %v1419_v10, %v348_v13  ;;  %v413_v46 = vadd.f32 %v1421_v12, %v349_v11  ;;  %v1440_v47 = vadd.f32 0.5, %v399_v16  ;;  %v1603_v37 = vcvt.s32.f32 %v1275_v38 }
  0x76   : > { %v414_v61 = vadd.f32 %v1428_v17, %v350_v36  ;;  %v415_v30 = vadd.f32 %v1430_v8, %v351_v44  ;;  %v1604_v31 = vcvt.s32.f32 %v1277_v39  ;;  %v360_v62 = vmul.f32 0.564, %v1368_v9 }
  0x77   : > { %v354_v45 = vsub.f32 %v1603_v37, %v1299_v0  ;;  %v825_v35 = vtrunc.f32 %v412_v26  ;;  %v827_v63 = vtrunc.f32 %v413_v46  ;;  %v361_v40 = vmul.f32 0.564, %v1377_v15 }
  0x78   : > { %v355_v32 = vsub.f32 %v1604_v31, %v1301_v1  ;;  %v829_v2 = vtrunc.f32 %v414_v61  ;;  %v831_v43 = vtrunc.f32 %v415_v30  ;;  %v368_v38 = vadd.f32 128.5, %v360_v62 }
  0x79   : > { %v362_v41 = vmul.f32 0.564, %v354_v45  ;;  %v826_v0 = vcvt.f32.s32 %v825_v35  ;;  %v828_v51 = vcvt.f32.s32 %v827_v63  ;;  %v369_v3 = vadd.f32 128.5, %v361_v40 }
  0x7a   : > { %v363_v50 = vmul.f32 0.564, %v355_v32  ;;  %v830_v6 = vcvt.f32.s32 %v829_v2  ;;  %v832_v7 = vcvt.f32.s32 %v831_v43  ;;  %v376_v39 = vfloor.f32 %v368_v38 }
  0x7b   : > { %v370_v48 = vadd.f32 128.5, %v362_v41  ;;  %v428_v1 = vand.u32 255, %v826_v0  ;;  %v429_v11 = vand.u32 255, %v828_v51  ;;  %v377_v9 = vfloor.f32 %v369_v3 }
  0x7c   : > { %v371_v13 = vadd.f32 128.5, %v363_v50  ;;  %v430_v36 = vand.u32 255, %v830_v6  ;;  %v431_v44 = vand.u32 255, %v832_v7  ;;  %v440_v26 = vadd.f32 %v1315_v24, %v376_v39 }
  0x7d   : > { %v378_v16 = vfloor.f32 %v370_v48  ;;  %v436_v46 = vcvt.s32.f32 %v428_v1  ;;  %v437_v37 = vcvt.s32.f32 %v429_v11  ;;  %v441_v45 = vadd.f32 %v1321_v27, %v377_v9 }
  0x7e   : > { %v379_v15 = vfloor.f32 %v371_v13  ;;  %v438_v30 = vcvt.s32.f32 %v430_v36  ;;  %v439_v31 = vcvt.s32.f32 %v431_v44  ;;  %v833_v62 = vtrunc.f32 %v440_v26 }
  0x7f   : > { %v442_v61 = vadd.f32 %v1328_v33, %v378_v16  ;;  %v1456_v35 = vadd.f32 -128.0, %v436_v46  ;;  %v1458_v63 = vadd.f32 -128.0, %v437_v37  ;;  %v835_v40 = vtrunc.f32 %v441_v45 }
  0x80   : > { %v443_v32 = vadd.f32 %v1330_v34, %v379_v15  ;;  %v1460_v2 = vadd.f32 -128.0, %v438_v30  ;;  %v1462_v24 = vadd.f32 -128.0, %v439_v31  ;;  %v834_v43 = vcvt.f32.s32 %v833_v62 }
  0x81   : > { %v837_v41 = vtrunc.f32 %v442_v61  ;;  %v500_v27 = vmul.f32 1.403, %v1456_v35  ;;  %v501_v33 = vmul.f32 1.403, %v1458_v63  ;;  %v836_v38 = vcvt.f32.s32 %v835_v40 }
  0x82   : > { %v839_v50 = vtrunc.f32 %v443_v32  ;;  %v502_v34 = vmul.f32 1.403, %v1460_v2  ;;  %v503_v51 = vmul.f32 1.403, %v1462_v24  ;;  %v456_v48 = vand.u32 255, %v834_v43 }
  0x83   : > { %v838_v0 = vcvt.f32.s32 %v837_v41  ;;  %v508_v6 = vadd.f32 %v500_v27, %v1432_v14  ;;  %v509_v7 = vadd.f32 %v501_v33, %v1434_v23  ;;  %v457_v13 = vand.u32 255, %v836_v38 }
  0x84   : > { %v840_v3 = vcvt.f32.s32 %v839_v50  ;;  %v510_v1 = vadd.f32 %v502_v34, %v1436_v25  ;;  %v511_v11 = vadd.f32 %v503_v51, %v1440_v47  ;;  %v464_v16 = vcvt.s32.f32 %v456_v48 }
  0x85   : > { %v458_v39 = vand.u32 255, %v838_v0  ;;  %v564_v36 = vmax.f32 %v508_v6, 0.0  ;;  %v565_v44 = vmax.f32 %v509_v7, 0.0  ;;  %v465_v15 = vcvt.s32.f32 %v457_v13 }
  0x86   : > { %v459_v9 = vand.u32 255, %v840_v3  ;;  %v566_v46 = vmax.f32 %v510_v1, 0.0  ;;  %v567_v37 = vmax.f32 %v511_v11, 0.0  ;;  %v1472_v61 = vadd.f32 -128.0, %v464_v16 }
  0x87   : > { %v466_v26 = vcvt.s32.f32 %v458_v39  ;;  %v572_v30 = vmin.f32 %v564_v36, 255.0  ;;  %v573_v31 = vmin.f32 %v565_v44, 255.0  ;;  %v1474_v32 = vadd.f32 -128.0, %v465_v15 }
  0x88   : > { %v467_v45 = vcvt.s32.f32 %v459_v9  ;;  %v574_v40 = vmin.f32 %v566_v46, 255.0  ;;  %v575_v41 = vmin.f32 %v567_v37, 255.0  ;;  %v512_v50 = vmul.f32 0.714, %v1349_v54 }
  0x89   : > { %v1476_v62 = vadd.f32 -128.0, %v466_v26  ;;  %v857_v27 = vtrunc.f32 %v572_v30  ;;  %v859_v33 = vtrunc.f32 %v573_v31  ;;  %v513_v38 = vmul.f32 0.714, %v1351_v55 }
  0x8a   : > { %v1478_v43 = vadd.f32 -128.0, %v467_v45  ;;  %v514_v0 = vmul.f32 0.714, %v1355_v58  ;;  %v861_v34 = vtrunc.f32 %v574_v40  ;;  %v863_v51 = vtrunc.f32 %v575_v41 }
  0x8b   : > { %v515_v3 = vmul.f32 0.714, %v1357_v59  ;;  %v520_v48 = vsub.f32 %v1317_v21, %v512_v50  ;;  %v858_v6 = vcvt.f32.s32 %v857_v27  ;;  %v860_v7 = vcvt.f32.s32 %v859_v33 }
  0x8c   : > { %v521_v13 = vsub.f32 %v1319_v22, %v513_v38  ;;  %v522_v39 = vsub.f32 %v1323_v28, %v514_v0  ;;  %v862_v1 = vcvt.f32.s32 %v861_v34  ;;  %v864_v54 = vcvt.f32.s32 %v863_v51 }
  0x8d   : > { %v523_v11 = vsub.f32 %v1325_v29, %v515_v3  ;;  %v528_v55 = vmul.f32 0.344, %v1472_v61  ;;  %v587_v9 = vpack.c.b16 %v860_v7, %v858_v6  ;;  %v529_v58 = vmul.f32 0.344, %v1474_v32 }
  0x8e   : > { %v530_v16 = vmul.f32 0.344, %v1476_v62  ;;  %v531_v59 = vmul.f32 0.344, %v1478_v43  ;;  %v588_v36 = vpack.c.b16 %v864_v54, %v862_v1  ;;  %v356_v15 = vsub.f32 %v276_v56, %v1395_v18 }
  0x8f   : > { %v536_v44 = vsub.f32 %v520_v48, %v528_v55  ;;  %v357_v26 = vsub.f32 %v277_v57, %v1397_v19  ;;  %v537_v46 = vsub.f32 %v521_v13, %v529_v58  ;;  %v358_v30 = vsub.f32 %v278_v4, %v1399_v60 }
  0x90   : > { %v538_v37 = vsub.f32 %v522_v39, %v530_v16  ;;  %v539_v45 = vsub.f32 %v523_v11, %v531_v59  ;;  %v589_v31 = vpack.c.b8 %v588_v36, %v587_v9  ;;  %v359_v41 = vsub.f32 %v279_v5, %v1401_v20 }
  0x91   : > { %v592_v40 = vmax.f32 %v536_v44, 0.0  ;;  %v364_v50 = vmul.f32 0.564, %v356_v15  ;;  %v593_v42 = vmax.f32 %v537_v46, 0.0  ;;  %v365_v27 = vmul.f32 0.564, %v357_v26 }
  0x92   : > { %v594_v56 = vmax.f32 %v538_v37, 0.0  ;;  %v595_v18 = vmax.f32 %v539_v45, 0.0  ;;  %591 = vst [vmem:[%s1425_s17 + $0x8] sm:$0xff] %v589_v31  ;;  %v366_v57 = vmul.f32 0.564, %v358_v30 }
  0x93   : > { %v600_v49 = vmin.f32 %v592_v40, 255.0  ;;  %v367_v19 = vmul.f32 0.564, %v359_v41  ;;  %v372_v33 = vadd.f32 128.5, %v364_v50  ;;  %v601_v38 = vmin.f32 %v593_v42, 255.0 }
  0x94   : > { %v602_v0 = vmin.f32 %v594_v56, 255.0  ;;  %v603_v52 = vmin.f32 %v595_v18, 255.0  ;;  %v373_v4 = vadd.f32 128.5, %v365_v27  ;;  %v374_v34 = vadd.f32 128.5, %v366_v57 }
  0x95   : > { %v865_v60 = vtrunc.f32 %v600_v49  ;;  %v375_v51 = vadd.f32 128.5, %v367_v19  ;;  %v380_v3 = vfloor.f32 %v372_v33  ;;  %v867_v53 = vtrunc.f32 %v601_v38 }
  0x96   : > { %v869_v5 = vtrunc.f32 %v602_v0  ;;  %v871_v20 = vtrunc.f32 %v603_v52  ;;  %v381_v48 = vfloor.f32 %v373_v4  ;;  %v382_v7 = vfloor.f32 %v374_v34 }
  0x97   : > { %v866_v6 = vcvt.f32.s32 %v865_v60  ;;  %v383_v13 = vfloor.f32 %v375_v51  ;;  %v444_v39 = vadd.f32 %v1419_v10, %v380_v3  ;;  %v868_v1 = vcvt.f32.s32 %v867_v53 }
  0x98   : > { %v870_v54 = vcvt.f32.s32 %v869_v5  ;;  %v872_v11 = vcvt.f32.s32 %v871_v20  ;;  %v445_v55 = vadd.f32 %v1421_v12, %v381_v48  ;;  %v446_v9 = vadd.f32 %v1428_v17, %v382_v7 }
  0x99   : > { %v447_v58 = vadd.f32 %v1430_v8, %v383_v13  ;;  %v841_v16 = vtrunc.f32 %v444_v39  ;;  %v516_v59 = vmul.f32 0.714, %v1456_v35  ;;  %v616_v36 = vpack.c.b16 %v868_v1, %v866_v6 }
  0x9a   : > { %v617_v44 = vpack.c.b16 %v872_v11, %v870_v54  ;;  %v843_v15 = vtrunc.f32 %v445_v55  ;;  %v517_v26 = vmul.f32 0.714, %v1458_v63  ;;  %v845_v10 = vtrunc.f32 %v446_v9 }
  0x9b   : > { %v842_v46 = vcvt.f32.s32 %v841_v16  ;;  %v847_v37 = vtrunc.f32 %v447_v58  ;;  %v518_v45 = vmul.f32 0.714, %v1460_v2  ;;  %v519_v17 = vmul.f32 0.714, %v1462_v24 }
  0x9c   : > { %v618_v30 = vpack.c.b8 %v617_v44, %v616_v36  ;;  %v844_v12 = vcvt.f32.s32 %v843_v15  ;;  %v524_v8 = vsub.f32 %v1432_v14, %v516_v59  ;;  %v846_v31 = vcvt.f32.s32 %v845_v10 }
  0x9d   : > { %v848_v40 = vcvt.f32.s32 %v847_v37  ;;  %v460_v35 = vand.u32 255, %v842_v46  ;;  %v525_v41 = vsub.f32 %v1434_v23, %v517_v26  ;;  %v526_v63 = vsub.f32 %v1436_v25, %v518_v45 }
  0x9e   : > { %801 = vst [vmem:[%s1425_s17 + $0x10] sm:$0xff] %v618_v30  ;;  %v461_v50 = vand.u32 255, %v844_v12  ;;  %v527_v42 = vsub.f32 %v1440_v47, %v519_v17  ;;  %v544_v56 = vmul.f32 1.773, %v1472_v61  ;;  %v462_v2 = vand.u32 255, %v846_v31 }
  0x9f   : > { %v463_v18 = vand.u32 255, %v848_v40  ;;  %v468_v27 = vcvt.s32.f32 %v460_v35  ;;  %v545_v24 = vmul.f32 1.773, %v1474_v32  ;;  %v546_v57 = vmul.f32 1.773, %v1476_v62 }
  0xa0   : > { %v469_v49 = vcvt.s32.f32 %v461_v50  ;;  %v547_v19 = vmul.f32 1.773, %v1478_v43  ;;  %v552_v33 = vadd.f32 %v544_v56, %v1317_v21  ;;  %v470_v38 = vcvt.s32.f32 %v462_v2 }
  0xa1   : > { %v471_v0 = vcvt.s32.f32 %v463_v18  ;;  %v797_v52 = vadd.f32 -128.0, %v468_v27  ;;  %v553_v4 = vadd.f32 %v545_v24, %v1319_v22  ;;  %v554_v61 = vadd.f32 %v546_v57, %v1323_v28 }
  0xa2   : > { %v798_v60 = vadd.f32 -128.0, %v469_v49  ;;  %v555_v34 = vadd.f32 %v547_v19, %v1325_v29  ;;  %v625_v51 = vmax.f32 %v552_v33, 0.0  ;;  %v799_v3 = vadd.f32 -128.0, %v470_v38 }
  0xa3   : > { %v800_v32 = vadd.f32 -128.0, %v471_v0  ;;  %v532_v53 = vmul.f32 0.344, %v797_v52  ;;  %v626_v5 = vmax.f32 %v553_v4, 0.0  ;;  %v627_v20 = vmax.f32 %v554_v61, 0.0 }
  0xa4   : > { %v533_v62 = vmul.f32 0.344, %v798_v60  ;;  %v628_v43 = vmax.f32 %v555_v34, 0.0  ;;  %v633_v48 = vmin.f32 %v625_v51, 255.0  ;;  %v534_v21 = vmul.f32 0.344, %v799_v3 }
  0xa5   : > { %v535_v6 = vmul.f32 0.344, %v800_v32  ;;  %v540_v7 = vsub.f32 %v524_v8, %v532_v53  ;;  %v634_v13 = vmin.f32 %v626_v5, 255.0  ;;  %v635_v22 = vmin.f32 %v627_v20, 255.0 }
  0xa6   : > { %v541_v39 = vsub.f32 %v525_v41, %v533_v62  ;;  %v636_v1 = vmin.f32 %v628_v43, 255.0  ;;  %v881_v54 = vtrunc.f32 %v633_v48  ;;  %v542_v28 = vsub.f32 %v526_v63, %v534_v21 }
  0xa7   : > { %v543_v11 = vsub.f32 %v527_v42, %v535_v6  ;;  %v596_v29 = vmax.f32 %v540_v7, 0.0  ;;  %v883_v55 = vtrunc.f32 %v634_v13  ;;  %v885_v16 = vtrunc.f32 %v635_v22 }
  0xa8   : > { %v597_v9 = vmax.f32 %v541_v39, 0.0  ;;  %v882_v58 = vcvt.f32.s32 %v881_v54  ;;  %v887_v59 = vtrunc.f32 %v636_v1  ;;  %v598_v36 = vmax.f32 %v542_v28, 0.0 }
  0xa9   : > { %v599_v44 = vmax.f32 %v543_v11, 0.0  ;;  %v604_v15 = vmin.f32 %v596_v29, 255.0  ;;  %v884_v26 = vcvt.f32.s32 %v883_v55  ;;  %v886_v10 = vcvt.f32.s32 %v885_v16 }
  0xaa   : > { %v605_v46 = vmin.f32 %v597_v9, 255.0  ;;  %v888_v37 = vcvt.f32.s32 %v887_v59  ;;  %v548_v45 = vmul.f32 1.773, %v797_v52  ;;  %v606_v30 = vmin.f32 %v598_v36, 255.0 }
  0xab   : > { %v607_v12 = vmin.f32 %v599_v44, 255.0  ;;  %v873_v17 = vtrunc.f32 %v604_v15  ;;  %v649_v8 = vpack.c.b16 %v884_v26, %v882_v58  ;;  %v549_v35 = vmul.f32 1.773, %v798_v60 }
  0xac   : > { %v875_v31 = vtrunc.f32 %v605_v46  ;;  %v650_v40 = vpack.c.b16 %v888_v37, %v886_v10  ;;  %v550_v41 = vmul.f32 1.773, %v799_v3  ;;  %v877_v63 = vtrunc.f32 %v606_v30 }
  0xad   : > { %v874_v50 = vcvt.f32.s32 %v873_v17  ;;  %v879_v42 = vtrunc.f32 %v607_v12  ;;  %v551_v56 = vmul.f32 1.773, %v800_v32  ;;  %v556_v27 = vadd.f32 %v548_v45, %v1432_v14 }
  0xae   : > { %v876_v2 = vcvt.f32.s32 %v875_v31  ;;  %v651_v18 = vpack.c.b8 %v650_v40, %v649_v8  ;;  %v557_v24 = vadd.f32 %v549_v35, %v1434_v23  ;;  %v878_v49 = vcvt.f32.s32 %v877_v63 }
  0xaf   : > { %v880_v57 = vcvt.f32.s32 %v879_v42  ;;  %v558_v19 = vadd.f32 %v550_v41, %v1436_v25  ;;  %v559_v33 = vadd.f32 %v551_v56, %v1440_v47  ;;  %v629_v0 = vmax.f32 %v556_v27, 0.0 }
  0xb0   : > { %v619_v38 = vpack.c.b16 %v876_v2, %v874_v50  ;;  %803 = vst [vmem:[%s1425_s17 + $0x20] sm:$0xff] %v651_v18  ;;  %v630_v52 = vmax.f32 %v557_v24, 0.0 }
  0xb1   : > { %v620_v4 = vpack.c.b16 %v880_v57, %v878_v49  ;;  %v631_v60 = vmax.f32 %v558_v19, 0.0  ;;  %v632_v61 = vmax.f32 %v559_v33, 0.0  ;;  %v637_v34 = vmin.f32 %v629_v0, 255.0 }
  0xb2   : > { %v638_v14 = vmin.f32 %v630_v52, 255.0 }
  0xb3   : > { %v621_v51 = vpack.c.b8 %v620_v4, %v619_v38  ;;  %v639_v23 = vmin.f32 %v631_v60, 255.0  ;;  %v640_v3 = vmin.f32 %v632_v61, 255.0  ;;  %v889_v32 = vtrunc.f32 %v637_v34 }
  0xb4   : > { %v891_v25 = vtrunc.f32 %v638_v14 }
  0xb5   : > { %802 = vst [vmem:[%s1425_s17 + $0x18] sm:$0xff] %v621_v51  ;;  %v893_v47 = vtrunc.f32 %v639_v23  ;;  %v895_v53 = vtrunc.f32 %v640_v3  ;;  %v890_v5 = vcvt.f32.s32 %v889_v32 }
  0xb6   : > { %v892_v62 = vcvt.f32.s32 %v891_v25 }
  0xb7   : > { %v894_v20 = vcvt.f32.s32 %v893_v47  ;;  %v896_v43 = vcvt.f32.s32 %v895_v53 }
  0xb8   : > { %v652_v48 = vpack.c.b16 %v892_v62, %v890_v5 }
  0xb9   : > { %v653_v21 = vpack.c.b16 %v896_v43, %v894_v20 }
  0xbb   : > { %v654_v6 = vpack.c.b8 %v653_v21, %v652_v48 }
  0xbd   : > { %804 = vst [vmem:[%s1425_s17 + $0x28] sm:$0xff] %v654_v6 }
  0xbe   : > { %1041 = shalt.err (!%p1038_p4)
}
  0xbf   : > { %s1042_s30 = scalar_lea.hbm %s1539_s22, 768  ;;  %s1046_s7 = scalar_lea.hbm %s1590_s2, 1536 }
  0xc0   : > { %p1043_p6 = scmp.ne.s32.totalorder %s1539_s22, %s1042_s30  ;;  %p1047_p0 = scmp.lt.s32.totalorder %s1539_s22, %s1590_s2 }
  0xc1   : > { %p1048_p3 = scmp.lt.s32.totalorder %s1046_s7, %s1042_s30 }
  0xc2   : > { %p1044_p9 = pnand %p1043_p6, %p1222_p13 }
  0xc3   : > { %p1049_p1 = por %p1048_p3, %p1047_p0 }
  0xc4   : > { %p1045_p12 = pneg %p1044_p9 }
  0xc6   : > { %p1050_p8 = pnand %p1049_p1, %p1045_p12 }
  0xc8   : > { %1053 = shalt.err (!%p1050_p8)
}
  0xc9   : > { %s1119_s24 = smov 128   ;;  %s1120_s17 = smov 8  }
  0xca   : > { %903 = dma.vmem_to_hbm [thread:$0]  (%p1222_p13), %s1534_s19, 768, %s1539_s22, %s659_s23, %s1119_s24, %s1119_s24, %s1120_s17  }
  0xcb PF: > { %s690_s21 = sand.u32 1, %s1092_s9   ;;  %p1605_p11 = scmp.ne.s32.totalorder %s1597_s20, 0 }
  0xcc   : > { %s691_s27 = scalar_lea.sflag [#allocation4], %s690_s21 }
  0xcd   : > { %p914_p2 = pnand %p776_p10, %p1605_p11 }
  0xcf   : > { %p915_p5 = pneg %p914_p2 }
  0xd1   : > { %1087 = dma.done.wait (%p915_p5), %s691_s27, 768  }
  0xd2   : > { %1089 = vsyncadd (%p915_p5), %s691_s27, 4294966528  ;;  %s19_s14 = sadd.s32 1, %s1112_s14   ;;  %s1606_s9 = smov %s1096_s10 }
  0xd3   : > { %p16_p7 = scmp.ge.s32.totalorder %s19_s14, 4   ;;  %s1607_s10 = smov %s1100_s11 }
  0xd4   : > { %s1608_s11 = smov %s1231_s8  ;;  %s1609_s12 = smov %s1108_s13 }
  0xd5   : > { %s1610_s13 = smov %s1612_s25  ;;  %18 = sbr.rel (!%p16_p7) target bundleno = 7 (0x7), region = 81 }
  0xda   :  { %696 = vsyncpa [#allocation3], 1 }
  0xdb   :  { %698 = vsyncpa [#allocation3 + $0x1], 1 }
  0xdc   :  { %699 = vsyncpa [#allocation6], 1 }
  0xdd   :  { %700 = vsyncpa [#allocation4], 1 }
  0xde   :  { %702 = vsyncpa [#allocation4 + $0x1], 1 }

</bundles_post_ra>
